<compile_context>
chip_gen: v6e
topology: v6e:2x2x1
jax: 0.10.0
libtpu: 0.0.40
codegen_flags: <defaults>
</compile_context>

<pallas_src>
import functools

import jax
import jax.numpy as jnp
from jax.experimental import pallas as pl
from jax.experimental.pallas import tpu as pltpu

HIDDEN = 64
HIDDEN_PAD = 128   # lane-dense hidden width
LANE = 128         # TPU lane width (last-dim granularity)


def _round_up(n, m):
    return ((n + m - 1) // m) * m


def mlp_kernel(x_ref, w1_ref, b1_ref, w2_ref, b2_ref, w3_ref, b3_ref, o_ref):
    # x_ref: (TM, obs) bf16, weights bf16 (in, out) layout, biases f32 (1, out).
    x = x_ref[...]
    # Layer 1: MXU matmul with f32 accumulation; bias/ReLU in f32 (v5e VPU has no bf16).
    h1 = jnp.dot(x, w1_ref[...], preferred_element_type=jnp.float32) + b1_ref[...]
    h1 = jnp.maximum(h1, 0.0).astype(jnp.bfloat16)
    # Layer 2
    h2 = jnp.dot(h1, w2_ref[...], preferred_element_type=jnp.float32) + b2_ref[...]
    h2 = jnp.maximum(h2, 0.0).astype(jnp.bfloat16)
    # Layer 3 (no activation)
    h3 = jnp.dot(h2, w3_ref[...], preferred_element_type=jnp.float32) + b3_ref[...]
    o_ref[...] = h3.astype(o_ref.dtype)


def init_params(key, obs_shape, act_shape, hidden=HIDDEN):
    # Torch nn.Linear default init: U(-1/sqrt(fan_in), +1/sqrt(fan_in)).
    # Weights stored transposed (in_features, out_features) so the kernel does x @ W + b.
    def linear(k, fan_in, fan_out):
        kw, kb = jax.random.split(k)
        bound = 1.0 / jnp.sqrt(jnp.float32(fan_in))
        w = jax.random.uniform(kw, (fan_in, fan_out), jnp.float32, -bound, bound)
        b = jax.random.uniform(kb, (1, fan_out), jnp.float32, -bound, bound)
        return w, b

    k1, k2, k3 = jax.random.split(key, 3)
    w1, b1 = linear(k1, obs_shape, hidden)
    w2, b2 = linear(k2, hidden, hidden)
    w3, b3 = linear(k3, hidden, act_shape)
    return (w1, b1, w2, b2, w3, b3)


def prepare_params(params):
    """Zero-pad hidden/act dims to 128 lanes and cast matmul operands to bf16.

    Zero padding is semantically exact: padded hidden units get zero weight and
    zero bias (ReLU(0) = 0) and contribute nothing downstream; padded output
    columns are sliced off in the wrapper.
    """
    w1, b1, w2, b2, w3, b3 = params
    obs, hidden = w1.shape
    act = w3.shape[1]
    hp = _round_up(max(hidden, HIDDEN_PAD), LANE)
    ap = _round_up(act, LANE)

    def pad2(a, rows, cols):
        return jnp.pad(a, ((0, rows - a.shape[0]), (0, cols - a.shape[1])))

    w1p = pad2(w1, obs, hp).astype(jnp.bfloat16)
    b1p = pad2(b1, 1, hp).astype(jnp.float32)
    w2p = pad2(w2, hp, hp).astype(jnp.bfloat16)
    b2p = pad2(b2, 1, hp).astype(jnp.float32)
    w3p = pad2(w3, hp, ap).astype(jnp.bfloat16)
    b3p = pad2(b3, 1, ap).astype(jnp.float32)
    return (w1p, b1p, w2p, b2p, w3p, b3p)


@functools.partial(jax.jit, static_argnames=("act_shape", "tm_max"))
def mlp_forward(x, prepared, act_shape, tm_max=512):
    w1, b1, w2, b2, w3, b3 = prepared
    batch, obs = x.shape
    hp = w1.shape[1]
    ap = w3.shape[1]

    # Batch tile: multiple of 8 sublanes; large tiles (512+) amortize per-step overhead.
    b8 = _round_up(batch, 8)
    tm = min(tm_max, b8)
    b_pad = _round_up(b8, tm)
    grid = (b_pad // tm,)

    x_p = jnp.pad(x, ((0, b_pad - batch), (0, 0))).astype(jnp.bfloat16)

    # Cost hint so XLA can overlap neighbours with this microsecond-scale call.
    flops = 2 * b_pad * (obs * hp + hp * hp + hp * ap)
    bytes_accessed = (
        x_p.size * 2
        + (w1.size + w2.size + w3.size) * 2
        + (b1.size + b2.size + b3.size) * 4
        + b_pad * ap * 4
    )

    full = lambda a: pl.BlockSpec(a.shape, lambda i: (0, 0))  # resident across grid

    out_padded = pl.pallas_call(
        mlp_kernel,
        out_shape=jax.ShapeDtypeStruct((b_pad, ap), jnp.float32),
        grid=grid,
        in_specs=[
            pl.BlockSpec((tm, obs), lambda i: (i, 0)),  # streamed x tiles
            full(w1), full(b1), full(w2), full(b2), full(w3), full(b3),
        ],
        out_specs=pl.BlockSpec((tm, ap), lambda i: (i, 0)),  # lane-dense output
        compiler_params=pltpu.CompilerParams(
            dimension_semantics=("parallel",),  # shard batch tiles across TCs (v7x)
        ),
        cost_estimate=pl.CostEstimate(
            flops=flops, transcendentals=0, bytes_accessed=bytes_accessed
        ),
    )(x_p, w1, b1, w2, b2, w3, b3)

    return out_padded[:batch, :act_shape]


def mlp_reference(x, params):
    w1, b1, w2, b2, w3, b3 = params
    h = jnp.maximum(x @ w1 + b1, 0.0)
    h = jnp.maximum(h @ w2 + b2, 0.0)
    return h @ w3 + b3


if __name__ == "__main__":
    key = jax.random.PRNGKey(0)
    k_params, k_x, k_x2 = jax.random.split(key, 3)

    batch, obs_shape, act_shape = 8, 16, 8
    params = init_params(k_params, obs_shape, act_shape)
    prepared = prepare_params(params)

    # Small-batch path (single grid step).
    x = jax.random.normal(k_x, (batch, obs_shape), jnp.float32)
    out = jax.block_until_ready(mlp_forward(x, prepared, act_shape))
    ref = mlp_reference(x, params)
    assert out.shape == (batch, act_shape)
    # bf16 matmul operands (f32 accumulation) vs pure-f32 reference -> loose tolerance.
    assert jnp.allclose(out, ref, atol=5e-2, rtol=5e-2), float(jnp.max(jnp.abs(out - ref)))

    # Larger batch exercising the gridded / pipelined path (grid > 1, padded batch).
    big = 300
    xb = jax.random.normal(k_x2, (big, obs_shape), jnp.float32)
    outb = jax.block_until_ready(mlp_forward(xb, prepared, act_shape, tm_max=128))
    refb = mlp_reference(xb, params)
    assert outb.shape == (big, act_shape)
    assert jnp.allclose(outb, refb, atol=5e-2, rtol=5e-2), float(jnp.max(jnp.abs(outb - refb)))

    print("KERNEL_OK")
</pallas_src>

<mosaic_0001>
module attributes {stable_mosaic.version = 11 : i64} {
  func.func @mlp_kernel(%arg0: i32, %arg1: memref<8x16xbf16, #tpu.memory_space<vmem>>, %arg2: memref<16x128xbf16, #tpu.memory_space<vmem>>, %arg3: memref<1x128xf32, #tpu.memory_space<vmem>>, %arg4: memref<128x128xbf16, #tpu.memory_space<vmem>>, %arg5: memref<1x128xf32, #tpu.memory_space<vmem>>, %arg6: memref<128x128xbf16, #tpu.memory_space<vmem>>, %arg7: memref<1x128xf32, #tpu.memory_space<vmem>>, %arg8: memref<8x128xf32, #tpu.memory_space<vmem>>) attributes {dimension_semantics = [#tpu.dimension_semantics<parallel>], iteration_bounds = array<i64: 1>, scalar_prefetch = 0 : i64, scratch_operands = 0 : i64, tpu.core_type = #tpu.core_type<tc>, window_params = [{transform_indices = @transform_0, window_bounds = array<i64: 8, 16>}, {pipeline_mode = #tpu.pipeline_mode<synchronous>, transform_indices = @transform_1, window_bounds = array<i64: 16, 128>}, {pipeline_mode = #tpu.pipeline_mode<synchronous>, transform_indices = @transform_2, window_bounds = array<i64: 1, 128>}, {pipeline_mode = #tpu.pipeline_mode<synchronous>, transform_indices = @transform_3, window_bounds = array<i64: 128, 128>}, {pipeline_mode = #tpu.pipeline_mode<synchronous>, transform_indices = @transform_4, window_bounds = array<i64: 1, 128>}, {pipeline_mode = #tpu.pipeline_mode<synchronous>, transform_indices = @transform_5, window_bounds = array<i64: 128, 128>}, {pipeline_mode = #tpu.pipeline_mode<synchronous>, transform_indices = @transform_6, window_bounds = array<i64: 1, 128>}, {transform_indices = @transform_7, window_bounds = array<i64: 8, 128>}]} {
    %c0 = arith.constant 0 : index
    %c0_0 = arith.constant 0 : index
    %0 = vector.load %arg1[%c0, %c0_0] : memref<8x16xbf16, #tpu.memory_space<vmem>>, vector<8x16xbf16>
    %c0_1 = arith.constant 0 : index
    %c0_2 = arith.constant 0 : index
    %1 = vector.load %arg2[%c0_1, %c0_2] : memref<16x128xbf16, #tpu.memory_space<vmem>>, vector<16x128xbf16>
    %cst = arith.constant dense<0.000000e+00> : vector<8x128xf32>
    %2 = tpu.matmul %0, %1, %cst {dimension_numbers = #tpu.dot_dimension_numbers<[1], [0], [0], [1], [0, 0, 1, 1], [], []>} : vector<8x16xbf16>, vector<16x128xbf16>, vector<8x128xf32> -> vector<8x128xf32>
    %c0_3 = arith.constant 0 : index
    %c0_4 = arith.constant 0 : index
    %3 = vector.load %arg3[%c0_3, %c0_4] : memref<1x128xf32, #tpu.memory_space<vmem>>, vector<1x128xf32>
    %4 = vector.broadcast %3 : vector<1x128xf32> to vector<8x128xf32>
    %5 = arith.addf %2, %4 : vector<8x128xf32>
    %cst_5 = arith.constant 0.000000e+00 : f32
    %6 = vector.broadcast %cst_5 : f32 to vector<8x128xf32>
    %7 = arith.maximumf %5, %6 : vector<8x128xf32>
    %8 = arith.truncf %7 : vector<8x128xf32> to vector<8x128xbf16>
    %c0_6 = arith.constant 0 : index
    %c0_7 = arith.constant 0 : index
    %9 = vector.load %arg4[%c0_6, %c0_7] : memref<128x128xbf16, #tpu.memory_space<vmem>>, vector<128x128xbf16>
    %cst_8 = arith.constant dense<0.000000e+00> : vector<8x128xf32>
    %10 = tpu.matmul %8, %9, %cst_8 {dimension_numbers = #tpu.dot_dimension_numbers<[1], [0], [0], [1], [0, 0, 1, 1], [], []>} : vector<8x128xbf16>, vector<128x128xbf16>, vector<8x128xf32> -> vector<8x128xf32>
    %c0_9 = arith.constant 0 : index
    %c0_10 = arith.constant 0 : index
    %11 = vector.load %arg5[%c0_9, %c0_10] : memref<1x128xf32, #tpu.memory_space<vmem>>, vector<1x128xf32>
    %12 = vector.broadcast %11 : vector<1x128xf32> to vector<8x128xf32>
    %13 = arith.addf %10, %12 : vector<8x128xf32>
    %cst_11 = arith.constant 0.000000e+00 : f32
    %14 = vector.broadcast %cst_11 : f32 to vector<8x128xf32>
    %15 = arith.maximumf %13, %14 : vector<8x128xf32>
    %16 = arith.truncf %15 : vector<8x128xf32> to vector<8x128xbf16>
    %c0_12 = arith.constant 0 : index
    %c0_13 = arith.constant 0 : index
    %17 = vector.load %arg6[%c0_12, %c0_13] : memref<128x128xbf16, #tpu.memory_space<vmem>>, vector<128x128xbf16>
    %cst_14 = arith.constant dense<0.000000e+00> : vector<8x128xf32>
    %18 = tpu.matmul %16, %17, %cst_14 {dimension_numbers = #tpu.dot_dimension_numbers<[1], [0], [0], [1], [0, 0, 1, 1], [], []>} : vector<8x128xbf16>, vector<128x128xbf16>, vector<8x128xf32> -> vector<8x128xf32>
    %c0_15 = arith.constant 0 : index
    %c0_16 = arith.constant 0 : index
    %19 = vector.load %arg7[%c0_15, %c0_16] : memref<1x128xf32, #tpu.memory_space<vmem>>, vector<1x128xf32>
    %20 = vector.broadcast %19 : vector<1x128xf32> to vector<8x128xf32>
    %21 = arith.addf %18, %20 : vector<8x128xf32>
    %c0_17 = arith.constant 0 : index
    %c0_18 = arith.constant 0 : index
    %22 = vector.load %arg8[%c0_17, %c0_18] : memref<8x128xf32, #tpu.memory_space<vmem>>, vector<8x128xf32>
    tpu.vector_store %arg8[%c0_17, %c0_18], %21 {strides = array<i32>} : memref<8x128xf32, #tpu.memory_space<vmem>>, vector<8x128xf32>,
    return
  }
  func.func @transform_0(%arg0: i32) -> (i32, i32) {
    %c0_i32 = arith.constant 0 : i32
    %c0_i32_0 = arith.constant 0 : i32
    return %arg0, %c0_i32 : i32, i32
  }
  func.func @transform_1(%arg0: i32) -> (i32, i32) {
    %c0_i32 = arith.constant 0 : i32
    %c0_i32_0 = arith.constant 0 : i32
    %c0_i32_1 = arith.constant 0 : i32
    return %c0_i32, %c0_i32_0 : i32, i32
  }
  func.func @transform_2(%arg0: i32) -> (i32, i32) {
    %c0_i32 = arith.constant 0 : i32
    %c0_i32_0 = arith.constant 0 : i32
    %c0_i32_1 = arith.constant 0 : i32
    return %c0_i32, %c0_i32_0 : i32, i32
  }
  func.func @transform_3(%arg0: i32) -> (i32, i32) {
    %c0_i32 = arith.constant 0 : i32
    %c0_i32_0 = arith.constant 0 : i32
    %c0_i32_1 = arith.constant 0 : i32
    return %c0_i32, %c0_i32_0 : i32, i32
  }
  func.func @transform_4(%arg0: i32) -> (i32, i32) {
    %c0_i32 = arith.constant 0 : i32
    %c0_i32_0 = arith.constant 0 : i32
    %c0_i32_1 = arith.constant 0 : i32
    return %c0_i32, %c0_i32_0 : i32, i32
  }
  func.func @transform_5(%arg0: i32) -> (i32, i32) {
    %c0_i32 = arith.constant 0 : i32
    %c0_i32_0 = arith.constant 0 : i32
    %c0_i32_1 = arith.constant 0 : i32
    return %c0_i32, %c0_i32_0 : i32, i32
  }
  func.func @transform_6(%arg0: i32) -> (i32, i32) {
    %c0_i32 = arith.constant 0 : i32
    %c0_i32_0 = arith.constant 0 : i32
    %c0_i32_1 = arith.constant 0 : i32
    return %c0_i32, %c0_i32_0 : i32, i32
  }
  func.func @transform_7(%arg0: i32) -> (i32, i32) {
    %c0_i32 = arith.constant 0 : i32
    %c0_i32_0 = arith.constant 0 : i32
    return %arg0, %c0_i32 : i32, i32
  }
}

</mosaic_0001>

<bundles_post_ra>
// kernel: mlp_forward.1
= control target key start
LH: loop header
LB: loop body
LE: loop exit
PB: predicated region body
PF: predicated region fallthrough
CT: control target
= control target key end

     0   :  { %12 = vsyncpa [#allocation3], 0  ;;  %s627_s0 = inlined_call_operand.vmem [shape: bf16[8,16], index: 0, kind: input, shape index: {}]   ;;  %s628_s1 = inlined_call_operand.vmem [shape: bf16[16,128], index: 1, kind: input, shape index: {}]   ;;  %s629_s2 = inlined_call_operand.vmem [shape: f32[1,128], index: 2, kind: input, shape index: {}]   ;;  %s630_s3 = inlined_call_operand.hbm [shape: bf16[128,128], index: 3, kind: input, shape index: {}]   ;;  %s631_s4 = inlined_call_operand.vmem [shape: f32[1,128], index: 4, kind: input, shape index: {}]   ;;  %s632_s5 = inlined_call_operand.hbm [shape: bf16[128,128], index: 5, kind: input, shape index: {}]   ;;  %s633_s6 = inlined_call_operand.vmem [shape: f32[1,128], index: 6, kind: input, shape index: {}]   ;;  %s634_s7 = inlined_call_operand.hbm [shape: f32[8,128], index: 7, kind: output, shape index: {}]  }
   0x1   :  { %13 = vsyncpa [#allocation6], 0 }
   0x2   :  { %14 = vsyncpa [#allocation4], 0  ;;  %s536_s24 = smov [#allocation2]  }
   0x3   :  { %s26_s25 = sshll.u32 %s536_s24, 4  ;;  %s27_s25 = int_to_ptr.vmem [resolvable:$true] %s26_s25 }
   0x4   :  { %s478_s26 = scalar_lea.vmem %s27_s25, 1024  ;;  %p483_p1 = scmp.lt.s32.totalorder %s27_s25, %s27_s25 }
   0x5   :  { %p479_p0 = scmp.ne.s32.totalorder %s27_s25, %s478_s26  ;;  %p484_p2 = scmp.lt.s32.totalorder %s478_s26, %s478_s26 }
   0x7   :  { %p485_p3 = por %p484_p2, %p483_p1 }
   0x9   :  { %p486_p4 = pnand %p485_p3, %p479_p0 }
   0xb   :  { %489 = shalt.err (!%p486_p4)
}
   0xc   :  { %s537_s27 = smov 64   ;;  %s538_s28 = smov 4  }
   0xd   :  { %32 = dma.hbm_to_vmem [thread:$0]  %s630_s3, 1024, %s27_s25, [#allocation3], %s537_s27, %s537_s27, %s538_s28  }
   0xe   :  { %s539_s8 = smov [#allocation5]  }
   0xf   :  { %s40_s9 = sshll.u32 %s539_s8, 4  ;;  %s41_s9 = int_to_ptr.vmem [resolvable:$true] %s40_s9 }
  0x10   :  { %s498_s10 = scalar_lea.vmem %s41_s9, 1024  ;;  %p503_p6 = scmp.lt.s32.totalorder %s41_s9, %s41_s9 }
  0x11   :  { %p499_p5 = scmp.ne.s32.totalorder %s41_s9, %s498_s10  ;;  %p504_p7 = scmp.lt.s32.totalorder %s498_s10, %s498_s10 }
  0x13   :  { %p505_p8 = por %p504_p7, %p503_p6 }
  0x15   :  { %p506_p9 = pnand %p505_p8, %p499_p5 }
  0x17   :  { %509 = shalt.err (!%p506_p9)
}
  0x18   :  { %46 = dma.hbm_to_vmem [thread:$0]  %s632_s5, 1024, %s41_s9, [#allocation6], %s537_s27, %s537_s27, %s538_s28  }
  0x19   :  { %530 = dma.done.wait [#allocation3], 1024  }
  0x1a   :  { %531 = vsyncadd [#allocation3], 4294966272 }
  0x1b   :  { %532 = dma.done.wait [#allocation6], 1024  }
  0x1c   :  { %533 = vsyncadd [#allocation6], 4294966272  ;;  %v540_v0 = vmov 0.0   ;;  %vm541_vm0 = vmmov 0   ;;  %v453_v1 = vld [vmem:[%s628_s1] sm:$0xff]   ;;  %vm72_vm1 = vcmask 130048  }
  0x1d   :  { %400 = vmatprep.subr.bf16.mxu0 %v540_v0  ;;  %402 = vmatprep.mubr.msk.bf16.mxu0 %vm541_vm0, %v540_v0  ;;  %v56_v2 = vld [vmem:[%s627_s0] sm:$0xf]  ;;  %v454_v3 = vld [vmem:[#allocation2 + $0x38] sm:$0xff]   ;;  %v455_v4 = vld [vmem:[#allocation2 + $0x30] sm:$0xff]   ;;  %s542_s18 = smov [#allocation7]  }
  0x1e   :  { %406 = vmatprep.subr.bf16.mxu1 %v540_v0  ;;  %422 = vmatprep.mubr.msk.bf16.mxu1 %vm541_vm0, %v540_v0  ;;  %v456_v5 = vld [vmem:[#allocation2 + $0x28] sm:$0xff]   ;;  %v457_v6 = vld [vmem:[#allocation2 + $0x20] sm:$0xff]   ;;  %v458_v7 = vld [vmem:[#allocation2 + $0x18] sm:$0xff]   ;;  %s349_s19 = sshll.u32 %s542_s18, 4  ;;  %s350_s19 = int_to_ptr.vmem [resolvable:$true] %s349_s19 }
  0x1f   :  { %401 = vmatpush3.bf16.msra.mxu0 %v453_v1  ;;  %407 = vmatpush3.bf16.msra.mxu1 %v454_v3  ;;  %v459_v8 = vld [vmem:[#allocation2 + $0x10] sm:$0xff]   ;;  %v460_v9 = vld [vmem:[#allocation2 + $0x8] sm:$0xff]   ;;  %v461_v10 = vld [vmem:[#allocation2] sm:$0xff]   ;;  %p515_p11 = scmp.lt.s32.totalorder %s350_s19, %s350_s19 }
  0x20   :  { %426 = vmatprep.subr.bf16.mxu0 %v540_v0  ;;  %408 = vmatprep.subr.bf16.mxu1 %v540_v0  ;;  %v462_v11 = vld [vmem:[#allocation5 + $0x38] sm:$0xff]   ;;  %v463_v12 = vld [vmem:[#allocation5 + $0x30] sm:$0xff]   ;;  %v464_v13 = vld [vmem:[#allocation5 + $0x28] sm:$0xff]  }
  0x21   :  { %v465_v14 = vld [vmem:[#allocation5 + $0x20] sm:$0xff]   ;;  %v466_v15 = vld [vmem:[#allocation5 + $0x18] sm:$0xff]   ;;  %v467_v16 = vld [vmem:[#allocation5 + $0x10] sm:$0xff]  }
  0x22   :  { %403 = vmatmul.mubr.msk.bf16.vlgmr.msra.gmra.mxu0 %vm72_vm1, %v56_v2  ;;  %v359_v17 = vld [vmem:[%s629_s2] ss:$0 sm:$0xff]  ;;  %v468_v25 = vld [vmem:[#allocation5 + $0x8] sm:$0xff]  }
  0x23   :  { %442 = vmatprep.mubr.msk.bf16.mxu0 %vm541_vm0, %v540_v0  ;;  %409 = vmatpush3.bf16.msra.mxu1 %v455_v4  ;;  %v469_v26 = vld [vmem:[#allocation5] sm:$0xff]  }
  0x24   :  { %410 = vmatprep.subr.bf16.mxu1 %v540_v0  ;;  %427 = vmatpush3.bf16.msra.mxu0 %v462_v11  ;;  %v362_v27 = vld [vmem:[%s631_s4] ss:$0 sm:$0xff]  ;;  %s510_s4 = scalar_lea.vmem %s350_s19, 128 }
  0x25   :  { %428 = vmatprep.subr.bf16.mxu0 %v540_v0  ;;  %v371_v35 = vld [vmem:[%s633_s6] ss:$0 sm:$0xff]  ;;  %p511_p10 = scmp.ne.s32.totalorder %s350_s19, %s510_s4  ;;  %p516_p12 = scmp.lt.s32.totalorder %s510_s4, %s510_s4 }
  0x27   :  { %411 = vmatpush3.bf16.msra.mxu1 %v456_v5  ;;  %p517_p13 = por %p516_p12, %p515_p11 }
  0x28   :  { %412 = vmatprep.subr.bf16.mxu1 %v540_v0  ;;  %429 = vmatpush3.bf16.msra.mxu0 %v463_v12 }
  0x29   :  { %430 = vmatprep.subr.bf16.mxu0 %v540_v0  ;;  %p518_p0 = pnand %p517_p13, %p511_p10 }
  0x2b   :  { %413 = vmatpush3.bf16.msra.mxu1 %v457_v6 }
  0x2c   :  { %414 = vmatprep.subr.bf16.mxu1 %v540_v0  ;;  %431 = vmatpush3.bf16.msra.mxu0 %v464_v13 }
  0x2d   :  { %432 = vmatprep.subr.bf16.mxu0 %v540_v0 }
  0x2f   :  { %415 = vmatpush3.bf16.msra.mxu1 %v458_v7 }
  0x30   :  { %416 = vmatprep.subr.bf16.mxu1 %v540_v0  ;;  %433 = vmatpush3.bf16.msra.mxu0 %v465_v14 }
  0x31   :  { %434 = vmatprep.subr.bf16.mxu0 %v540_v0 }
  0x33   :  { %417 = vmatpush3.bf16.msra.mxu1 %v459_v8 }
  0x34   :  { %418 = vmatprep.subr.bf16.mxu1 %v540_v0  ;;  %435 = vmatpush3.bf16.msra.mxu0 %v466_v15 }
  0x35   :  { %436 = vmatprep.subr.bf16.mxu0 %v540_v0 }
  0x37   :  { %419 = vmatpush3.bf16.msra.mxu1 %v460_v9 }
  0x38   :  { %420 = vmatprep.subr.bf16.mxu1 %v540_v0  ;;  %437 = vmatpush3.bf16.msra.mxu0 %v467_v16 }
  0x39   :  { %438 = vmatprep.subr.bf16.mxu0 %v540_v0 }
  0x3b   :  { %421 = vmatpush3.bf16.msra.mxu1 %v461_v10 }
  0x3c   :  { %439 = vmatpush3.bf16.msra.mxu0 %v468_v25 }
  0x3d   :  { %440 = vmatprep.subr.bf16.mxu0 %v540_v0 }
  0x40   :  { %441 = vmatpush3.bf16.msra.mxu0 %v469_v26 }
  0xe2   :  { %v110_v18 = vpop.f32.mrf.mxu0 }
  0xe3   :  { %v111_v19 = vadd.f32 %v359_v17, %v110_v18 }
  0xe4   :  { %v404_v20 = vpop.f32.mrf.mxu0 }
  0xe5   :  { %v116_v21 = vmax.f32 %v111_v19, 0.0 }
  0xe6   :  { %v113_v22 = vpop.f32.mrf.mxu0 }
  0xe7   :  { %v117_v23 = vpack.c.bf16 %v116_v21, %v116_v21 }
  0xe8   :  { %v405_v24 = vpop.f32.mrf.mxu0 }
  0xe9   :  { %423 = vmatmul.mubr.bf16.vlgmr.msra.gmra.mxu1 %v117_v23 }
 0x1a9   :  { %v223_v28 = vpop.f32.mrf.mxu1 }
 0x1aa   :  { %v224_v29 = vadd.f32 %v362_v27, %v223_v28 }
 0x1ab   :  { %v424_v30 = vpop.f32.mrf.mxu1 }
 0x1ac   :  { %v229_v31 = vmax.f32 %v224_v29, 0.0 }
 0x1ad   :  { %v226_v32 = vpop.f32.mrf.mxu1 }
 0x1ae   :  { %v230_v33 = vpack.c.bf16 %v229_v31, %v229_v31 }
 0x1af   :  { %v425_v34 = vpop.f32.mrf.mxu1 }
 0x1b0   :  { %443 = vmatmul.mubr.bf16.vlgmr.msra.gmra.mxu0 %v230_v33 }
 0x270   :  { %v336_v36 = vpop.f32.mrf.mxu0 }
 0x271   :  { %v337_v37 = vadd.f32 %v371_v35, %v336_v36 }
 0x272   :  { %v444_v38 = vpop.f32.mrf.mxu0 }
 0x273   :  { %342 = vst [vmem:[#allocation7] sm:$0xff] %v337_v37 }
 0x274   :  { %v339_v39 = vpop.f32.mrf.mxu0 }
 0x275   :  { %521 = shalt.err (!%p518_p0)
}
 0x276   :  { %352 = dma.vmem_to_hbm [thread:$0]  %s350_s19, 128, %s634_s7, [#allocation4]   ;;  %v445_v40 = vpop.f32.mrf.mxu0 }
 0x277   :  { %534 = dma.done.wait [#allocation4], 128  }
 0x278   :  { %535 = vsyncadd [#allocation4], 4294967168 }
 0x279   :  { %356 = vsyncpa [#allocation3], 1 }
 0x27a   :  { %357 = vsyncpa [#allocation6], 1 }
 0x27b   :  { %358 = vsyncpa [#allocation4], 1 }

</bundles_post_ra>
